<compile_context>
chip_gen: v5e
topology: v5e:2x2
jax: 0.10.0
libtpu: 0.0.40
codegen_flags: <defaults>
</compile_context>

<pallas_src>
import math

import jax
import jax.numpy as jnp
from jax.experimental import pallas as pl
from jax.experimental.pallas import tpu as pltpu


def _layer_scale_kernel(x_ref, gamma_ref, o_ref):
    # x_ref: (TR, D_eff) tile, gamma_ref: (1, D_eff) resident, o_ref: (TR, D_eff) tile.
    # Rank-matched multiply; (TR, D) * (1, D) is a cheap sublane broadcast on the VPU.
    o_ref[...] = x_ref[...] * gamma_ref[...]


def layer_scale(x, gamma):
    """x: (..., D), gamma: (D,) -> x * gamma (broadcast over the last dim)."""
    orig_shape = x.shape
    D = orig_shape[-1]
    rows = 1
    for s in orig_shape[:-1]:
        rows *= s

    gamma_row = gamma.reshape(1, D).astype(x.dtype)
    x2d = x.reshape(rows, D)

    # --- lane-densify: make the last dim a multiple of 128 by folding rows into lanes ---
    d_eff = D
    rows_eff = rows
    gamma_eff = gamma_row
    if D % 128 != 0:
        fold = math.lcm(D, 128) // D
        if fold > 1 and rows % fold == 0:
            rows_eff = rows // fold
            d_eff = D * fold
            x2d = x2d.reshape(rows_eff, d_eff)
            gamma_eff = jnp.tile(gamma_row, (1, fold))  # (1, d_eff)
        # else: fall back to (rows, D); still correct, just masked partial stores.

    # --- pick a row tile: ~4 MiB per buffer, multiple of 8 sublanes (or full extent) ---
    itemsize = jnp.dtype(x.dtype).itemsize
    target_bytes = 4 * 1024 * 1024
    tr = (target_bytes // max(1, d_eff * itemsize)) // 8 * 8
    tr = max(8, tr)
    if tr >= rows_eff:
        tr = rows_eff  # full extent is always a legal block dim

    grid = (pl.cdiv(rows_eff, tr),)

    out2d = pl.pallas_call(
        _layer_scale_kernel,
        out_shape=jax.ShapeDtypeStruct((rows_eff, d_eff), x.dtype),
        grid_spec=pltpu.PrefetchScalarGridSpec(
            num_scalar_prefetch=0,
            grid=grid,
            in_specs=[
                # streaming row tiles of x
                pl.BlockSpec((tr, d_eff), lambda r: (r, 0)),
                # gamma: same (constant) block every step -> stays resident in VMEM
                pl.BlockSpec((1, d_eff), lambda r: (0, 0)),
            ],
            out_specs=pl.BlockSpec((tr, d_eff), lambda r: (r, 0)),
        ),
        compiler_params=pltpu.CompilerParams(
            dimension_semantics=("parallel",),
            # Above the v5e 16 MiB default, comfortably below v7x's 64 MiB physical VMEM;
            # double-buffered in+out at ~4 MiB/buffer uses ~16-17 MiB of this.
            vmem_limit_bytes=48 * 1024 * 1024,
        ),
    )(x2d, gamma_eff)

    return out2d.reshape(orig_shape)


if __name__ == "__main__":
    key = jax.random.PRNGKey(0)
    B, N, D = 2, 8, 32
    x = jax.random.normal(key, (B, N, D), dtype=jnp.float32)

    # Deterministic parameter init, matching LayerScale.__init__: gamma = init_values * ones(dim)
    init_values = 1e-5
    gamma = init_values * jnp.ones((D,), dtype=jnp.float32)

    out = layer_scale(x, gamma)
    jax.block_until_ready(out)

    # Reference check (plain JAX broadcast, same as torch `x * gamma`).
    ref = x * gamma
    assert out.shape == ref.shape, "shape mismatch vs reference"
    assert jnp.allclose(out, ref, atol=1e-6, rtol=1e-6), "mismatch vs reference"

    print("KERNEL_OK")
</pallas_src>

<mosaic_0001>
module attributes {stable_mosaic.version = 11 : i64} {
  func.func @_layer_scale_kernel(%arg0: i32, %arg1: memref<4x128xf32, #tpu.memory_space<vmem>>, %arg2: memref<1x128xf32, #tpu.memory_space<vmem>>, %arg3: memref<4x128xf32, #tpu.memory_space<vmem>>) attributes {dimension_semantics = [#tpu.dimension_semantics<parallel>], iteration_bounds = array<i64: 1>, scalar_prefetch = 0 : i64, scratch_operands = 0 : i64, tpu.core_type = #tpu.core_type<tc>, window_params = [{transform_indices = @transform_0, window_bounds = array<i64: 4, 128>}, {pipeline_mode = #tpu.pipeline_mode<synchronous>, transform_indices = @transform_1, window_bounds = array<i64: 1, 128>}, {transform_indices = @transform_2, window_bounds = array<i64: 4, 128>}]} {
    %c0 = arith.constant 0 : index
    %c0_0 = arith.constant 0 : index
    %0 = vector.load %arg1[%c0, %c0_0] : memref<4x128xf32, #tpu.memory_space<vmem>>, vector<4x128xf32>
    %c0_1 = arith.constant 0 : index
    %c0_2 = arith.constant 0 : index
    %1 = vector.load %arg2[%c0_1, %c0_2] : memref<1x128xf32, #tpu.memory_space<vmem>>, vector<1x128xf32>
    %2 = vector.broadcast %1 : vector<1x128xf32> to vector<4x128xf32>
    %3 = arith.mulf %0, %2 : vector<4x128xf32>
    %c0_3 = arith.constant 0 : index
    %c0_4 = arith.constant 0 : index
    %4 = vector.load %arg3[%c0_3, %c0_4] : memref<4x128xf32, #tpu.memory_space<vmem>>, vector<4x128xf32>
    tpu.vector_store %arg3[%c0_3, %c0_4], %3 {strides = array<i32>} : memref<4x128xf32, #tpu.memory_space<vmem>>, vector<4x128xf32>,
    return
  }
  func.func @transform_0(%arg0: i32) -> (i32, i32) {
    %c0_i32 = arith.constant 0 : i32
    %c0_i32_0 = arith.constant 0 : i32
    return %arg0, %c0_i32 : i32, i32
  }
  func.func @transform_1(%arg0: i32) -> (i32, i32) {
    %c0_i32 = arith.constant 0 : i32
    %c0_i32_0 = arith.constant 0 : i32
    %c0_i32_1 = arith.constant 0 : i32
    return %c0_i32, %c0_i32_0 : i32, i32
  }
  func.func @transform_2(%arg0: i32) -> (i32, i32) {
    %c0_i32 = arith.constant 0 : i32
    %c0_i32_0 = arith.constant 0 : i32
    return %arg0, %c0_i32 : i32, i32
  }
}

</mosaic_0001>

<bundles_post_ra>
// kernel: tpu_custom_call.1
= control target key start
LH: loop header
LB: loop body
LE: loop exit
PB: predicated region body
PF: predicated region fallthrough
CT: control target
= control target key end

     0   :  { %7 = vsyncpa [#allocation3], 0  ;;  %s174_s0 = inlined_call_operand.hbm [shape: f32[4,128], index: 0, kind: input, shape index: {}]   ;;  %s175_s1 = inlined_call_operand.hbm [shape: f32[1,128], index: 1, kind: input, shape index: {}]   ;;  %s176_s2 = inlined_call_operand.hbm [shape: f32[4,128], index: 2, kind: output, shape index: {}]  }
   0x1   :  { %8 = vsyncpa [#allocation6], 0 }
   0x2   :  { %9 = vsyncpa [#allocation4], 0  ;;  %s15_s11 = sshll.u32 %s174_s0, 4  ;;  %s147_s12 = smov [#allocation2]   ;;  %s16_s11 = int_to_ptr.hbm [resolvable:$true] %s15_s11 }
   0x3   :  { %s17_s13 = sshll.u32 %s147_s12, 4  ;;  %s26_s16 = sshll.u32 %s175_s1, 4  ;;  %s18_s13 = int_to_ptr.vmem [resolvable:$true] %s17_s13  ;;  %s27_s16 = int_to_ptr.hbm [resolvable:$true] %s26_s16 }
   0x4   :  { %20 = dma.hbm_to_vmem [thread:$0]  %s16_s11, 64, %s18_s13, [#allocation3]  }
   0x5   :  { %s148_s17 = smov [#allocation5]  }
   0x6   :  { %s28_s18 = sshll.u32 %s148_s17, 4  ;;  %s29_s18 = int_to_ptr.vmem [resolvable:$true] %s28_s18 }
   0x7   :  { %31 = dma.hbm_to_vmem [thread:$0]  %s27_s16, 16, %s29_s18, [#allocation6]  }
   0x8   :  { %141 = dma.done.wait [#allocation3], 64  }
   0x9   :  { %142 = vsyncadd [#allocation3], 4294967232 }
   0xa   :  { %143 = dma.done.wait [#allocation6], 16  }
   0xb   :  { %144 = vsyncadd [#allocation6], 4294967280  ;;  %s149_s19 = smov [#allocation7]   ;;  %s54_s22 = sshll.u32 %s176_s2, 4  ;;  %v40_v0 = vld [vmem:[#allocation2] sm:$0xf]  ;;  %s55_s22 = int_to_ptr.hbm [resolvable:$true] %s54_s22 }
   0xc   :  { %s52_s0 = sshll.u32 %s149_s19, 4  ;;  %v68_v1 = vld [vmem:[#allocation5] ss:$0 sm:$0xff]  ;;  %s53_s0 = int_to_ptr.vmem [resolvable:$true] %s52_s0 }
   0xd   :  { %v45_v2 = vmul.f32 %v68_v1, %v40_v0 }
   0xf   :  { %46 = vst [vmem:[#allocation7] sm:$0xf] %v45_v2 }
  0x10   :  { %57 = dma.vmem_to_hbm [thread:$0]  %s53_s0, 64, %s55_s22, [#allocation4]  }
  0x11   :  { %145 = dma.done.wait [#allocation4], 64  }
  0x12   :  { %146 = vsyncadd [#allocation4], 4294967232 }
  0x13   :  { %62 = vsyncpa [#allocation3], 1 }
  0x14   :  { %63 = vsyncpa [#allocation6], 1 }
  0x15   :  { %64 = vsyncpa [#allocation4], 1 }

</bundles_post_ra>
